<compile_context>
chip_gen: v6e
topology: v6e:2x2x1
jax: 0.10.0
libtpu: 0.0.40
codegen_flags: <defaults>
</compile_context>

<pallas_src>
import math
from functools import partial

import jax
import jax.numpy as jnp
from jax.experimental import pallas as pl
from jax.experimental.pallas import tpu as pltpu


_TM_LADDER = (512, 256, 128, 64, 32, 16, 8)


# ---------------------------------------------------------------------------
# Portable in-kernel dropout mask (stateless hash; no TPU-only PRNG primitives,
# so it also lowers under interpret / CPU emulation).
# TODO(synk): mask is not bit-identical to torch's RNG stream (semantics match:
# inverted dropout with P(drop) = p).
# ---------------------------------------------------------------------------
def _dropout_keep_mask(shape, seed_scalar, row_off, col_off, rate):
    rows = (jax.lax.broadcasted_iota(jnp.int32, shape, 0) + row_off).astype(jnp.uint32)
    cols = (jax.lax.broadcasted_iota(jnp.int32, shape, 1) + col_off).astype(jnp.uint32)
    s = seed_scalar.astype(jnp.uint32)
    key = (rows * jnp.uint32(0x9E3779B1)) \
        ^ (cols * jnp.uint32(0x85EBCA77)) \
        ^ (s * jnp.uint32(0xC2B2AE3D))
    # murmur3-style finalizer (wrapping uint32 arithmetic on the VPU)
    key = key ^ (key >> 16)
    key = key * jnp.uint32(0x7FEB352D)
    key = key ^ (key >> 15)
    key = key * jnp.uint32(0x846CA68B)
    key = key ^ (key >> 16)
    masked = key & jnp.uint32(0x7FFFFFFF)            # uniform in [0, 2^31)
    thresh = jnp.uint32(min(int(rate * (2 ** 31)), 2 ** 31 - 1))
    return masked >= thresh                          # P(keep) = 1 - rate


# ---------------------------------------------------------------------------
# Kernel bodies
# ---------------------------------------------------------------------------
def _ffn_resident_kernel(dropout_rate, seed_ref,
                         x_ref, w1_ref, b1_ref, w2_ref, b2_ref, o_ref):
    """Both weight matrices resident in VMEM; one token block per grid step."""
    tm = x_ref.shape[0]
    h = jnp.dot(x_ref[...], w1_ref[...], preferred_element_type=jnp.float32)
    h = jnp.maximum(h + b1_ref[...], 0.0)
    if dropout_rate > 0.0:
        keep = _dropout_keep_mask(h.shape, seed_ref[0],
                                  row_off=pl.program_id(0) * tm,
                                  col_off=0, rate=dropout_rate)
        h = jnp.where(keep, h, 0.0)
    y = jnp.dot(h.astype(w2_ref.dtype), w2_ref[...],
                preferred_element_type=jnp.float32)
    if dropout_rate > 0.0:
        # Hoisted inverted-dropout scale: applied once on (tm, d_model), not (tm, d_ff).
        y = y * (1.0 / (1.0 - dropout_rate))
    o_ref[...] = (y + b2_ref[...]).astype(o_ref.dtype)


def _ffn_stream_kernel(dropout_rate, seed_ref,
                       x_ref, w1_ref, b1_ref, w2_ref, b2_ref, o_ref, acc_ref):
    """Streams d_ff tiles (last grid axis) and accumulates the second matmul
    into a (tm, d_model) f32 scratch; for weights too large to stay resident."""
    j = pl.program_id(1)

    @pl.when(j == 0)
    def _():
        acc_ref[...] = jnp.zeros_like(acc_ref)

    tm = x_ref.shape[0]
    tf = w1_ref.shape[1]
    h = jnp.dot(x_ref[...], w1_ref[...], preferred_element_type=jnp.float32)
    h = jnp.maximum(h + b1_ref[...], 0.0)
    if dropout_rate > 0.0:
        keep = _dropout_keep_mask(h.shape, seed_ref[0],
                                  row_off=pl.program_id(0) * tm,
                                  col_off=j * tf, rate=dropout_rate)
        h = jnp.where(keep, h, 0.0)
    acc_ref[...] += jnp.dot(h.astype(w2_ref.dtype), w2_ref[...],
                            preferred_element_type=jnp.float32)

    @pl.when(j == pl.num_programs(1) - 1)
    def _():
        y = acc_ref[...]
        if dropout_rate > 0.0:
            y = y * (1.0 / (1.0 - dropout_rate))
        o_ref[...] = (y + b2_ref[...]).astype(o_ref.dtype)


# ---------------------------------------------------------------------------
# Wrapper helpers
# ---------------------------------------------------------------------------
def _vmem_capacity_bytes():
    try:
        cap = int(pltpu.get_tpu_info().vmem_capacity_bytes)
        if cap >= (16 << 20):
            return cap
    except Exception:
        pass
    return 128 << 20  # v5e/v6e physical; conservative fallback if query unavailable


def _block_spec(shape, index_map, *, single_buffer=False):
    if single_buffer and hasattr(pl, "Buffered"):
        try:
            return pl.BlockSpec(shape, index_map, pipeline_mode=pl.Buffered(1))
        except TypeError:
            pass
    return pl.BlockSpec(shape, index_map)


def _pick_tm(n, d_model, hidden_cols, budget_bytes):
    n8 = 8 * pl.cdiv(max(n, 1), 8)
    best = 8
    for tm in _TM_LADDER:
        if tm > n8:
            continue
        # hidden activation + accumulator + (double-buffered) in/out blocks
        approx = tm * hidden_cols * 4 + tm * d_model * 4 + 4 * tm * d_model * 4
        if approx <= budget_bytes:
            best = tm
            break
    # Prefer a tile that divides n exactly (skips the wrapper-side pad copy),
    # as long as it is at most 2x smaller than the best-fitting tile.
    if n % best != 0:
        for tm in _TM_LADDER:
            if tm <= best and tm >= best // 2 and n % tm == 0:
                return tm
    return best


def feed_forward_block(x, w1, b1, w2, b2, *,
                       dropout_rate: float = 0.0, seed: int = 0,
                       use_bf16_matmul: bool = False,
                       force_stream: bool = False, ff_tile=None):
    """Pallas equivalent of FeedForwardBlock.forward:
       linear_2(dropout(relu(linear_1(x))))."""
    orig_shape = x.shape
    d_model, d_ff = w1.shape
    assert x.shape[-1] == d_model and w2.shape == (d_ff, d_model)
    assert b1.shape[-1] == d_ff and b2.shape[-1] == d_model

    out_dtype = x.dtype
    cdtype = jnp.bfloat16 if use_bf16_matmul else x.dtype  # matmul operand dtype
    wbytes = jnp.dtype(cdtype).itemsize
    obytes = jnp.dtype(out_dtype).itemsize

    xf = x.reshape(-1, d_model).astype(cdtype)
    n = xf.shape[0]

    vmem_cap = _vmem_capacity_bytes()
    resident_weight_budget = int(0.45 * vmem_cap)  # single-buffered weights budget
    weight_bytes = 2 * d_model * d_ff * wbytes

    # ---- path selection: fully-resident weights vs d_ff streaming ----
    stream = force_stream or (ff_tile is not None) or weight_bytes > resident_weight_budget
    tf = None
    if stream:
        if ff_tile is not None:
            assert d_ff % ff_tile == 0 and ff_tile % 128 == 0
            tf = ff_tile
        else:
            tf = next((c for c in (2048, 1024, 512, 256, 128) if d_ff % c == 0), None)
            if tf is None:
                # TODO(synk): d_ff not a multiple of 128 has no clean lane-dense
                # streaming tile; fall back to fully-resident weights.
                stream = False

    hidden_cols = tf if stream else d_ff
    tm = _pick_tm(n, d_model, hidden_cols, budget_bytes=16 << 20)
    n_pad = tm * pl.cdiv(n, tm)
    if n_pad != n:
        xf = jnp.pad(xf, ((0, n_pad - n), (0, 0)))

    b1_2d = b1.reshape(1, d_ff).astype(jnp.float32)
    b2_2d = b2.reshape(1, d_model).astype(jnp.float32)
    seed_arr = jnp.asarray([seed], dtype=jnp.int32)
    w1c = w1.astype(cdtype)
    w2c = w2.astype(cdtype)

    # ---- cost estimate (helps XLA schedule around this fused call) ----
    cost = pl.CostEstimate(
        flops=4 * n_pad * d_model * d_ff,
        transcendentals=0,
        bytes_accessed=int(n_pad * d_model * (wbytes + obytes)
                           + weight_bytes + (d_ff + d_model) * 4),
    )

    # ---- explicit VMEM budget (defaults are 16/32 MiB and too small for
    #      resident weights; cap below per-core physical capacity) ----
    if stream:
        needed = (2 * 2 * d_model * tf * wbytes            # w1/w2 tile double-buffers
                  + 2 * (tf + d_model) * 4                 # bias tiles
                  + 2 * tm * d_model * (wbytes + obytes)   # x/out double-buffers
                  + tm * tf * 4 + tm * d_model * 4)        # hidden + accumulator
    else:
        needed = (weight_bytes + (d_ff + d_model) * 4      # resident, single-buffered
                  + 2 * tm * d_model * (wbytes + obytes)
                  + 2 * tm * d_ff * 4)
    vmem_limit = int(min(max(needed * 3 // 2 + (8 << 20), 32 << 20),
                         int(0.85 * vmem_cap)))

    if stream:
        grid = (n_pad // tm, d_ff // tf)
        in_specs = [
            _block_spec((tm, d_model), lambda i, j, s: (i, 0)),
            _block_spec((d_model, tf), lambda i, j, s: (0, j)),
            _block_spec((1, tf), lambda i, j, s: (0, j)),
            _block_spec((tf, d_model), lambda i, j, s: (j, 0)),
            _block_spec((1, d_model), lambda i, j, s: (0, 0), single_buffer=True),
        ]
        out_specs = pl.BlockSpec((tm, d_model), lambda i, j, s: (i, 0))
        scratch = [pltpu.VMEM((tm, d_model), jnp.float32)]
        dims = ("parallel", "arbitrary")
        kernel = partial(_ffn_stream_kernel, float(dropout_rate))
    else:
        grid = (n_pad // tm,)
        in_specs = [
            _block_spec((tm, d_model), lambda i, s: (i, 0)),
            # Weights/biases: constant block index -> DMA'd once, resident in
            # VMEM, single-buffered (no pointless second pipeline buffer).
            _block_spec((d_model, d_ff), lambda i, s: (0, 0), single_buffer=True),
            _block_spec((1, d_ff), lambda i, s: (0, 0), single_buffer=True),
            _block_spec((d_ff, d_model), lambda i, s: (0, 0), single_buffer=True),
            _block_spec((1, d_model), lambda i, s: (0, 0), single_buffer=True),
        ]
        out_specs = pl.BlockSpec((tm, d_model), lambda i, s: (i, 0))
        scratch = []
        dims = ("parallel",)
        kernel = partial(_ffn_resident_kernel, float(dropout_rate))

    out = pl.pallas_call(
        kernel,
        out_shape=jax.ShapeDtypeStruct((n_pad, d_model), out_dtype),
        grid_spec=pltpu.PrefetchScalarGridSpec(
            num_scalar_prefetch=1,          # dropout seed lives in SMEM
            grid=grid,
            in_specs=in_specs,
            out_specs=out_specs,
            scratch_shapes=scratch,
        ),
        compiler_params=pltpu.CompilerParams(
            dimension_semantics=dims,
            vmem_limit_bytes=vmem_limit,
        ),
        cost_estimate=cost,
    )(seed_arr, xf, w1c, b1_2d, w2c, b2_2d)

    return out[:n].reshape(orig_shape)


if __name__ == "__main__":
    batch, seq = 2, 8
    d_model, d_ff = 128, 512
    dropout_p = 0.1

    key = jax.random.PRNGKey(0)
    kx, k1, kb1, k2, kb2 = jax.random.split(key, 5)

    # nn.Linear-style init: U(-1/sqrt(fan_in), 1/sqrt(fan_in)).
    bound1 = 1.0 / math.sqrt(d_model)
    bound2 = 1.0 / math.sqrt(d_ff)
    w1 = jax.random.uniform(k1, (d_model, d_ff), jnp.float32, -bound1, bound1)
    b1 = jax.random.uniform(kb1, (d_ff,), jnp.float32, -bound1, bound1)
    w2 = jax.random.uniform(k2, (d_ff, d_model), jnp.float32, -bound2, bound2)
    b2 = jax.random.uniform(kb2, (d_model,), jnp.float32, -bound2, bound2)

    x = jax.random.normal(kx, (batch, seq, d_model), dtype=jnp.float32)

    # Pure-JAX reference (eval mode: dropout is identity).
    h_ref = jnp.maximum(x.reshape(-1, d_model) @ w1 + b1, 0.0)
    ref = (h_ref @ w2 + b2).reshape(batch, seq, d_model)

    # 1) Eval mode, fully-resident-weights path.
    out = jax.block_until_ready(
        feed_forward_block(x, w1, b1, w2, b2, dropout_rate=0.0))
    assert out.shape == (batch, seq, d_model)
    assert jnp.allclose(out, ref, atol=1e-2, rtol=1e-2), "resident path mismatch"

    # 2) Eval mode, d_ff-streaming path (forced; exercises the accumulator axis).
    out_s = jax.block_until_ready(
        feed_forward_block(x, w1, b1, w2, b2, dropout_rate=0.0,
                           force_stream=True, ff_tile=128))
    assert jnp.allclose(out_s, ref, atol=1e-2, rtol=1e-2), "streaming path mismatch"

    # 3) Training mode (dropout on) — portable in-kernel hash mask.
    out_d = jax.block_until_ready(
        feed_forward_block(x, w1, b1, w2, b2, dropout_rate=dropout_p, seed=123))
    assert out_d.shape == (batch, seq, d_model)
    assert bool(jnp.all(jnp.isfinite(out_d)))
    assert not bool(jnp.allclose(out_d, out)), "dropout produced no change"

    print("KERNEL_OK")
</pallas_src>

<mosaic_0001>
module attributes {stable_mosaic.version = 11 : i64} {
  func.func @_ffn_resident_kernel(%arg0: i32, %arg1: memref<1xi32, #tpu.memory_space<smem>>, %arg2: memref<16x128xf32, #tpu.memory_space<vmem>>, %arg3: memref<128x512xf32, #tpu.memory_space<vmem>>, %arg4: memref<1x512xf32, #tpu.memory_space<vmem>>, %arg5: memref<512x128xf32, #tpu.memory_space<vmem>>, %arg6: memref<1x128xf32, #tpu.memory_space<vmem>>, %arg7: memref<16x128xf32, #tpu.memory_space<vmem>>) attributes {dimension_semantics = [#tpu.dimension_semantics<parallel>], iteration_bounds = array<i64: 1>, scalar_prefetch = 1 : i64, scratch_operands = 0 : i64, tpu.core_type = #tpu.core_type<tc>, window_params = [{transform_indices = @transform_0, window_bounds = array<i64: 16, 128>}, {pipeline_mode = #tpu.pipeline_mode<synchronous>, transform_indices = @transform_1, window_bounds = array<i64: 128, 512>}, {pipeline_mode = #tpu.pipeline_mode<synchronous>, transform_indices = @transform_2, window_bounds = array<i64: 1, 512>}, {pipeline_mode = #tpu.pipeline_mode<synchronous>, transform_indices = @transform_3, window_bounds = array<i64: 512, 128>}, {pipeline_mode = #tpu.pipeline_mode<synchronous>, transform_indices = @transform_4, window_bounds = array<i64: 1, 128>}, {transform_indices = @transform_5, window_bounds = array<i64: 16, 128>}]} {
    %c0 = arith.constant 0 : index
    %c0_0 = arith.constant 0 : index
    %0 = vector.load %arg2[%c0, %c0_0] : memref<16x128xf32, #tpu.memory_space<vmem>>, vector<16x128xf32>
    %c0_1 = arith.constant 0 : index
    %c0_2 = arith.constant 0 : index
    %1 = vector.load %arg3[%c0_1, %c0_2] : memref<128x512xf32, #tpu.memory_space<vmem>>, vector<128x512xf32>
    %cst = arith.constant dense<0.000000e+00> : vector<16x512xf32>
    %2 = tpu.matmul %0, %1, %cst {dimension_numbers = #tpu.dot_dimension_numbers<[1], [0], [0], [1], [0, 0, 1, 1], [], []>} : vector<16x128xf32>, vector<128x512xf32>, vector<16x512xf32> -> vector<16x512xf32>
    %c0_3 = arith.constant 0 : index
    %c0_4 = arith.constant 0 : index
    %3 = vector.load %arg4[%c0_3, %c0_4] : memref<1x512xf32, #tpu.memory_space<vmem>>, vector<1x512xf32>
    %4 = vector.broadcast %3 : vector<1x512xf32> to vector<16x512xf32>
    %5 = arith.addf %2, %4 : vector<16x512xf32>
    %cst_5 = arith.constant 0.000000e+00 : f32
    %6 = vector.broadcast %cst_5 : f32 to vector<16x512xf32>
    %7 = arith.maximumf %5, %6 : vector<16x512xf32>
    %c0_6 = arith.constant 0 : index
    %c0_7 = arith.constant 0 : index
    %8 = vector.load %arg5[%c0_6, %c0_7] : memref<512x128xf32, #tpu.memory_space<vmem>>, vector<512x128xf32>
    %cst_8 = arith.constant dense<0.000000e+00> : vector<16x128xf32>
    %9 = tpu.matmul %7, %8, %cst_8 {dimension_numbers = #tpu.dot_dimension_numbers<[1], [0], [0], [1], [0, 0, 1, 1], [], []>} : vector<16x512xf32>, vector<512x128xf32>, vector<16x128xf32> -> vector<16x128xf32>
    %c0_9 = arith.constant 0 : index
    %c0_10 = arith.constant 0 : index
    %10 = vector.load %arg6[%c0_9, %c0_10] : memref<1x128xf32, #tpu.memory_space<vmem>>, vector<1x128xf32>
    %11 = vector.broadcast %10 : vector<1x128xf32> to vector<16x128xf32>
    %12 = arith.addf %9, %11 : vector<16x128xf32>
    %c0_11 = arith.constant 0 : index
    %c0_12 = arith.constant 0 : index
    %13 = vector.load %arg7[%c0_11, %c0_12] : memref<16x128xf32, #tpu.memory_space<vmem>>, vector<16x128xf32>
    tpu.vector_store %arg7[%c0_11, %c0_12], %12 {strides = array<i32>} : memref<16x128xf32, #tpu.memory_space<vmem>>, vector<16x128xf32>,
    return
  }
  func.func @transform_0(%arg0: i32, %arg1: memref<1xi32, #tpu.memory_space<smem>>) -> (i32, i32) {
    %c0_i32 = arith.constant 0 : i32
    %c0_i32_0 = arith.constant 0 : i32
    return %arg0, %c0_i32 : i32, i32
  }
  func.func @transform_1(%arg0: i32, %arg1: memref<1xi32, #tpu.memory_space<smem>>) -> (i32, i32) {
    %c0_i32 = arith.constant 0 : i32
    %c0_i32_0 = arith.constant 0 : i32
    %c0_i32_1 = arith.constant 0 : i32
    return %c0_i32, %c0_i32_0 : i32, i32
  }
  func.func @transform_2(%arg0: i32, %arg1: memref<1xi32, #tpu.memory_space<smem>>) -> (i32, i32) {
    %c0_i32 = arith.constant 0 : i32
    %c0_i32_0 = arith.constant 0 : i32
    %c0_i32_1 = arith.constant 0 : i32
    return %c0_i32, %c0_i32_0 : i32, i32
  }
  func.func @transform_3(%arg0: i32, %arg1: memref<1xi32, #tpu.memory_space<smem>>) -> (i32, i32) {
    %c0_i32 = arith.constant 0 : i32
    %c0_i32_0 = arith.constant 0 : i32
    %c0_i32_1 = arith.constant 0 : i32
    return %c0_i32, %c0_i32_0 : i32, i32
  }
  func.func @transform_4(%arg0: i32, %arg1: memref<1xi32, #tpu.memory_space<smem>>) -> (i32, i32) {
    %c0_i32 = arith.constant 0 : i32
    %c0_i32_0 = arith.constant 0 : i32
    %c0_i32_1 = arith.constant 0 : i32
    return %c0_i32, %c0_i32_0 : i32, i32
  }
  func.func @transform_5(%arg0: i32, %arg1: memref<1xi32, #tpu.memory_space<smem>>) -> (i32, i32) {
    %c0_i32 = arith.constant 0 : i32
    %c0_i32_0 = arith.constant 0 : i32
    return %arg0, %c0_i32 : i32, i32
  }
}

</mosaic_0001>

<bundles_post_ra>
// kernel: tpu_custom_call.1
= control target key start
LH: loop header
LB: loop body
LE: loop exit
PB: predicated region body
PF: predicated region fallthrough
CT: control target
= control target key end

     0   :  { %12 = vsyncpa [#allocation5], 0  ;;  %s802_s0 = inlined_call_operand.<no memory space> [shape: s32[1], index: 0, kind: input, shape index: {}]   ;;  %s803_s1 = inlined_call_operand.hbm [shape: f32[16,128], index: 1, kind: input, shape index: {}]   ;;  %s804_s2 = inlined_call_operand.hbm [shape: f32[128,512], index: 2, kind: input, shape index: {}]   ;;  %s805_s3 = inlined_call_operand.vmem [shape: f32[1,512], index: 3, kind: input, shape index: {}]   ;;  %s806_s4 = inlined_call_operand.hbm [shape: f32[512,128], index: 4, kind: input, shape index: {}]   ;;  %s807_s5 = inlined_call_operand.vmem [shape: f32[1,128], index: 5, kind: input, shape index: {}]   ;;  %s808_s6 = inlined_call_operand.hbm [shape: f32[16,128], index: 6, kind: output, shape index: {}]  }
   0x1   :  { %13 = vsyncpa [#allocation8], 0 }
   0x2   :  { %14 = vsyncpa [#allocation6], 0  ;;  %s727_s0 = smov [#allocation7]  }
   0x3   :  { %s32_s21 = sshll.u32 %s727_s0, 4  ;;  %s33_s21 = int_to_ptr.vmem [resolvable:$true] %s32_s21 }
   0x4   :  { %s649_s22 = scalar_lea.vmem %s33_s21, 8192  ;;  %p654_p1 = scmp.lt.s32.totalorder %s33_s21, %s33_s21 }
   0x5   :  { %p650_p0 = scmp.ne.s32.totalorder %s33_s21, %s649_s22  ;;  %p655_p2 = scmp.lt.s32.totalorder %s649_s22, %s649_s22 }
   0x7   :  { %p656_p3 = por %p655_p2, %p654_p1 }
   0x9   :  { %p657_p4 = pnand %p656_p3, %p650_p0 }
   0xb   :  { %660 = shalt.err (!%p657_p4)
}
   0xc   :  { %s728_s23 = smov 512   ;;  %s729_s24 = smov 32  }
   0xd   :  { %38 = dma.hbm_to_vmem [thread:$0]  %s804_s2, 8192, %s33_s21, [#allocation8], %s728_s23, %s728_s23, %s729_s24  }
   0xe   :  { %s730_s27 = smov [#allocation4]  }
   0xf   :  { %s20_s28 = sshll.u32 %s730_s27, 4  ;;  %s21_s28 = int_to_ptr.vmem [resolvable:$true] %s20_s28 }
  0x10   :  { %s669_s29 = scalar_lea.vmem %s21_s28, 256  ;;  %p674_p6 = scmp.lt.s32.totalorder %s21_s28, %s21_s28 }
  0x11   :  { %p670_p5 = scmp.ne.s32.totalorder %s21_s28, %s669_s29  ;;  %p675_p7 = scmp.lt.s32.totalorder %s669_s29, %s669_s29 }
  0x13   :  { %p676_p8 = por %p675_p7, %p674_p6 }
  0x15   :  { %p677_p9 = pnand %p676_p8, %p670_p5 }
  0x17   :  { %680 = shalt.err (!%p677_p9)
}
  0x18   :  { %s731_s30 = smov 128   ;;  %s732_s7 = smov 8  }
  0x19   :  { %26 = dma.hbm_to_vmem [thread:$0]  %s803_s1, 256, %s21_s28, [#allocation5], %s731_s30, %s731_s30, %s732_s7  }
  0x1a   :  { %s733_s2 = smov [#allocation9]  }
  0x1b   :  { %s46_s10 = sshll.u32 %s733_s2, 4  ;;  %s47_s10 = int_to_ptr.vmem [resolvable:$true] %s46_s10 }
  0x1c   :  { %s689_s11 = scalar_lea.vmem %s47_s10, 8192  ;;  %p694_p11 = scmp.lt.s32.totalorder %s47_s10, %s47_s10 }
  0x1d   :  { %p690_p10 = scmp.ne.s32.totalorder %s47_s10, %s689_s11  ;;  %p695_p12 = scmp.lt.s32.totalorder %s689_s11, %s689_s11 }
  0x1f   :  { %p696_p13 = por %p695_p12, %p694_p11 }
  0x21   :  { %p697_p0 = pnand %p696_p13, %p690_p10 }
  0x23   :  { %700 = shalt.err (!%p697_p0)
}
  0x24   :  { %52 = dma.hbm_to_vmem [thread:$0]  %s806_s4, 8192, %s47_s10, [#allocation8], %s731_s30, %s731_s30, %s732_s7  }
  0x25   :  { %721 = dma.done.wait [#allocation5], 256  }
  0x26   :  { %722 = vsyncadd [#allocation5], 4294967040 }
  0x27   :  { %723 = dma.done.wait [#allocation8], 16384  }
  0x28   :  { %724 = vsyncadd [#allocation8], 4294950912  ;;  %v734_v0 = vmov 0.0   ;;  %v127_v1 = vld [vmem:[#allocation7 + $0x1e8] sm:$0xff]  ;;  %v129_v2 = vld [vmem:[#allocation7 + $0x1f8] sm:$0xff]  ;;  %s735_s15 = smov [#allocation10]  }
  0x29   :  { %216 = vmatprep.mubr.f32.mxu0 %v734_v0  ;;  %293 = vmatprep.mubr.f32.mxu1 %v734_v0  ;;  %v126_v3 = vld [vmem:[#allocation7 + $0x1e0] sm:$0xff]  ;;  %v128_v4 = vld [vmem:[#allocation7 + $0x1f0] sm:$0xff]  ;;  %v123_v5 = vld [vmem:[#allocation7 + $0x1c8] sm:$0xff]  ;;  %s542_s16 = sshll.u32 %s735_s15, 4  ;;  %s543_s16 = int_to_ptr.vmem [resolvable:$true] %s542_s16 }
  0x2a   :  { %152 = vmatprep.subr.mxu0 %v127_v1  ;;  %229 = vmatprep.subr.mxu1 %v129_v2  ;;  %v125_v6 = vld [vmem:[#allocation7 + $0x1d8] sm:$0xff]  ;;  %v122_v7 = vld [vmem:[#allocation7 + $0x1c0] sm:$0xff]  ;;  %v124_v8 = vld [vmem:[#allocation7 + $0x1d0] sm:$0xff]  ;;  %p706_p2 = scmp.lt.s32.totalorder %s543_s16, %s543_s16 }
  0x2b   :  { %153 = vmatpush1.msra.mxu0 %v126_v3  ;;  %230 = vmatpush1.msra.mxu1 %v128_v4  ;;  %v119_v9 = vld [vmem:[#allocation7 + $0x1a8] sm:$0xff]  ;;  %v121_v10 = vld [vmem:[#allocation7 + $0x1b8] sm:$0xff]  ;;  %v118_v11 = vld [vmem:[#allocation7 + $0x1a0] sm:$0xff] }
  0x2c   :  { %154 = vmatprep.subr.mxu0 %v123_v5  ;;  %231 = vmatprep.subr.mxu1 %v125_v6  ;;  %v120_v12 = vld [vmem:[#allocation7 + $0x1b0] sm:$0xff]  ;;  %v115_v13 = vld [vmem:[#allocation7 + $0x188] sm:$0xff]  ;;  %v117_v14 = vld [vmem:[#allocation7 + $0x198] sm:$0xff] }
  0x2d   :  { %155 = vmatpush1.msra.mxu0 %v122_v7  ;;  %232 = vmatpush1.msra.mxu1 %v124_v8  ;;  %v114_v15 = vld [vmem:[#allocation7 + $0x180] sm:$0xff]  ;;  %v116_v16 = vld [vmem:[#allocation7 + $0x190] sm:$0xff]  ;;  %v111_v17 = vld [vmem:[#allocation7 + $0x168] sm:$0xff] }
  0x2e   :  { %156 = vmatprep.subr.mxu0 %v119_v9  ;;  %233 = vmatprep.subr.mxu1 %v121_v10  ;;  %v113_v18 = vld [vmem:[#allocation7 + $0x178] sm:$0xff]  ;;  %v110_v19 = vld [vmem:[#allocation7 + $0x160] sm:$0xff]  ;;  %v112_v20 = vld [vmem:[#allocation7 + $0x170] sm:$0xff] }
  0x2f   :  { %157 = vmatpush1.msra.mxu0 %v118_v11  ;;  %234 = vmatpush1.msra.mxu1 %v120_v12  ;;  %v107_v21 = vld [vmem:[#allocation7 + $0x148] sm:$0xff]  ;;  %v109_v22 = vld [vmem:[#allocation7 + $0x158] sm:$0xff]  ;;  %v106_v23 = vld [vmem:[#allocation7 + $0x140] sm:$0xff] }
  0x30   :  { %158 = vmatprep.subr.mxu0 %v115_v13  ;;  %235 = vmatprep.subr.mxu1 %v117_v14  ;;  %v108_v24 = vld [vmem:[#allocation7 + $0x150] sm:$0xff]  ;;  %v103_v25 = vld [vmem:[#allocation7 + $0x128] sm:$0xff]  ;;  %v105_v26 = vld [vmem:[#allocation7 + $0x138] sm:$0xff] }
  0x31   :  { %159 = vmatpush1.msra.mxu0 %v114_v15  ;;  %236 = vmatpush1.msra.mxu1 %v116_v16  ;;  %v102_v27 = vld [vmem:[#allocation7 + $0x120] sm:$0xff]  ;;  %v104_v28 = vld [vmem:[#allocation7 + $0x130] sm:$0xff]  ;;  %v99_v29 = vld [vmem:[#allocation7 + $0x108] sm:$0xff] }
  0x32   :  { %160 = vmatprep.subr.mxu0 %v111_v17  ;;  %237 = vmatprep.subr.mxu1 %v113_v18  ;;  %v101_v30 = vld [vmem:[#allocation7 + $0x118] sm:$0xff]  ;;  %v98_v31 = vld [vmem:[#allocation7 + $0x100] sm:$0xff]  ;;  %v100_v32 = vld [vmem:[#allocation7 + $0x110] sm:$0xff] }
  0x33   :  { %161 = vmatpush1.msra.mxu0 %v110_v19  ;;  %238 = vmatpush1.msra.mxu1 %v112_v20  ;;  %v95_v33 = vld [vmem:[#allocation7 + $0xe8] sm:$0xff]  ;;  %v97_v34 = vld [vmem:[#allocation7 + $0xf8] sm:$0xff]  ;;  %v94_v35 = vld [vmem:[#allocation7 + $0xe0] sm:$0xff] }
  0x34   :  { %162 = vmatprep.subr.mxu0 %v107_v21  ;;  %239 = vmatprep.subr.mxu1 %v109_v22  ;;  %v96_v36 = vld [vmem:[#allocation7 + $0xf0] sm:$0xff]  ;;  %v91_v37 = vld [vmem:[#allocation7 + $0xc8] sm:$0xff]  ;;  %v93_v38 = vld [vmem:[#allocation7 + $0xd8] sm:$0xff] }
  0x35   :  { %163 = vmatpush1.msra.mxu0 %v106_v23  ;;  %240 = vmatpush1.msra.mxu1 %v108_v24  ;;  %v90_v39 = vld [vmem:[#allocation7 + $0xc0] sm:$0xff]  ;;  %v92_v40 = vld [vmem:[#allocation7 + $0xd0] sm:$0xff]  ;;  %v87_v41 = vld [vmem:[#allocation7 + $0xa8] sm:$0xff] }
  0x36   :  { %164 = vmatprep.subr.mxu0 %v103_v25  ;;  %241 = vmatprep.subr.mxu1 %v105_v26  ;;  %v89_v42 = vld [vmem:[#allocation7 + $0xb8] sm:$0xff]  ;;  %v86_v43 = vld [vmem:[#allocation7 + $0xa0] sm:$0xff]  ;;  %v88_v44 = vld [vmem:[#allocation7 + $0xb0] sm:$0xff] }
  0x37   :  { %165 = vmatpush1.msra.mxu0 %v102_v27  ;;  %242 = vmatpush1.msra.mxu1 %v104_v28  ;;  %v83_v45 = vld [vmem:[#allocation7 + $0x88] sm:$0xff]  ;;  %v85_v46 = vld [vmem:[#allocation7 + $0x98] sm:$0xff]  ;;  %v82_v47 = vld [vmem:[#allocation7 + $0x80] sm:$0xff] }
  0x38   :  { %166 = vmatprep.subr.mxu0 %v99_v29  ;;  %243 = vmatprep.subr.mxu1 %v101_v30  ;;  %v84_v48 = vld [vmem:[#allocation7 + $0x90] sm:$0xff]  ;;  %v79_v49 = vld [vmem:[#allocation7 + $0x68] sm:$0xff]  ;;  %v81_v50 = vld [vmem:[#allocation7 + $0x78] sm:$0xff] }
  0x39   :  { %167 = vmatpush1.msra.mxu0 %v98_v31  ;;  %244 = vmatpush1.msra.mxu1 %v100_v32  ;;  %v78_v51 = vld [vmem:[#allocation7 + $0x60] sm:$0xff]  ;;  %v80_v52 = vld [vmem:[#allocation7 + $0x70] sm:$0xff]  ;;  %v75_v53 = vld [vmem:[#allocation7 + $0x48] sm:$0xff] }
  0x3a   :  { %168 = vmatprep.subr.mxu0 %v95_v33  ;;  %245 = vmatprep.subr.mxu1 %v97_v34  ;;  %v77_v54 = vld [vmem:[#allocation7 + $0x58] sm:$0xff]  ;;  %v74_v55 = vld [vmem:[#allocation7 + $0x40] sm:$0xff]  ;;  %v76_v56 = vld [vmem:[#allocation7 + $0x50] sm:$0xff] }
  0x3b   :  { %169 = vmatpush1.msra.mxu0 %v94_v35  ;;  %246 = vmatpush1.msra.mxu1 %v96_v36  ;;  %v71_v57 = vld [vmem:[#allocation7 + $0x28] sm:$0xff]  ;;  %v73_v58 = vld [vmem:[#allocation7 + $0x38] sm:$0xff]  ;;  %v70_v59 = vld [vmem:[#allocation7 + $0x20] sm:$0xff] }
  0x3c   :  { %170 = vmatprep.subr.mxu0 %v91_v37  ;;  %247 = vmatprep.subr.mxu1 %v93_v38  ;;  %v72_v60 = vld [vmem:[#allocation7 + $0x30] sm:$0xff]  ;;  %v67_v61 = vld [vmem:[#allocation7 + $0x8] sm:$0xff]  ;;  %v69_v62 = vld [vmem:[#allocation7 + $0x18] sm:$0xff] }
  0x3d   :  { %171 = vmatpush1.msra.mxu0 %v90_v39  ;;  %248 = vmatpush1.msra.mxu1 %v92_v40  ;;  %v66_v63 = vld [vmem:[#allocation7] sm:$0xff]  ;;  %v68_v1 = vld [vmem:[#allocation7 + $0x10] sm:$0xff]  ;;  %v345_v3 = vld [vmem:[#allocation9 + $0xf8] sm:$0xff] }
  0x3e   :  { %172 = vmatprep.subr.mxu0 %v87_v41  ;;  %249 = vmatprep.subr.mxu1 %v89_v42  ;;  %v64_v2 = vld [vmem:[#allocation4] sm:$0xff]  ;;  %v377_v4 = vld [vmem:[#allocation9 + $0x1f8] sm:$0xff]  ;;  %v343_v12 = vld [vmem:[#allocation9 + $0xe8] sm:$0xff] }
  0x3f   :  { %173 = vmatpush1.msra.mxu0 %v86_v43  ;;  %250 = vmatpush1.msra.mxu1 %v88_v44  ;;  %v329_v5 = vld [vmem:[#allocation9 + $0x78] sm:$0xff]  ;;  %v344_v8 = vld [vmem:[#allocation9 + $0xf0] sm:$0xff]  ;;  %v375_v13 = vld [vmem:[#allocation9 + $0x1e8] sm:$0xff] }
  0x40   :  { %174 = vmatprep.subr.mxu0 %v83_v45  ;;  %251 = vmatprep.subr.mxu1 %v85_v46  ;;  %v361_v6 = vld [vmem:[#allocation9 + $0x178] sm:$0xff]  ;;  %v376_v9 = vld [vmem:[#allocation9 + $0x1f0] sm:$0xff]  ;;  %v327_v14 = vld [vmem:[#allocation9 + $0x68] sm:$0xff] }
  0x41   :  { %175 = vmatpush1.msra.mxu0 %v82_v47  ;;  %252 = vmatpush1.msra.mxu1 %v84_v48  ;;  %v65_v7 = vld [vmem:[#allocation4 + $0x8] sm:$0xff]  ;;  %v328_v10 = vld [vmem:[#allocation9 + $0x70] sm:$0xff]  ;;  %v359_v15 = vld [vmem:[#allocation9 + $0x168] sm:$0xff] }
  0x42   :  { %176 = vmatprep.subr.mxu0 %v79_v49  ;;  %253 = vmatprep.subr.mxu1 %v81_v50  ;;  %v360_v11 = vld [vmem:[#allocation9 + $0x170] sm:$0xff]  ;;  %v374_v16 = vld [vmem:[#allocation9 + $0x1e0] sm:$0xff]  ;;  %v341_v19 = vld [vmem:[#allocation9 + $0xd8] sm:$0xff] }
  0x43   :  { %177 = vmatpush1.msra.mxu0 %v78_v51  ;;  %254 = vmatpush1.msra.mxu1 %v80_v52  ;;  %v326_v17 = vld [vmem:[#allocation9 + $0x60] sm:$0xff]  ;;  %v373_v20 = vld [vmem:[#allocation9 + $0x1d8] sm:$0xff]  ;;  %v340_v23 = vld [vmem:[#allocation9 + $0xd0] sm:$0xff] }
  0x44   :  { %178 = vmatprep.subr.mxu0 %v75_v53  ;;  %255 = vmatprep.subr.mxu1 %v77_v54  ;;  %v358_v18 = vld [vmem:[#allocation9 + $0x160] sm:$0xff]  ;;  %v325_v21 = vld [vmem:[#allocation9 + $0x58] sm:$0xff]  ;;  %v372_v24 = vld [vmem:[#allocation9 + $0x1d0] sm:$0xff] }
  0x45   :  { %179 = vmatpush1.msra.mxu0 %v74_v55  ;;  %256 = vmatpush1.msra.mxu1 %v76_v56  ;;  %v357_v22 = vld [vmem:[#allocation9 + $0x158] sm:$0xff]  ;;  %v324_v25 = vld [vmem:[#allocation9 + $0x50] sm:$0xff]  ;;  %v339_v27 = vld [vmem:[#allocation9 + $0xc8] sm:$0xff] }
  0x46   :  { %180 = vmatprep.subr.mxu0 %v71_v57  ;;  %257 = vmatprep.subr.mxu1 %v73_v58  ;;  %v356_v26 = vld [vmem:[#allocation9 + $0x150] sm:$0xff]  ;;  %v371_v28 = vld [vmem:[#allocation9 + $0x1c8] sm:$0xff]  ;;  %v338_v31 = vld [vmem:[#allocation9 + $0xc0] sm:$0xff] }
  0x47   :  { %181 = vmatpush1.msra.mxu0 %v70_v59  ;;  %258 = vmatpush1.msra.mxu1 %v72_v60  ;;  %v323_v29 = vld [vmem:[#allocation9 + $0x48] sm:$0xff]  ;;  %v370_v32 = vld [vmem:[#allocation9 + $0x1c0] sm:$0xff]  ;;  %v337_v35 = vld [vmem:[#allocation9 + $0xb8] sm:$0xff] }
  0x48   :  { %182 = vmatprep.subr.mxu0 %v67_v61  ;;  %259 = vmatprep.subr.mxu1 %v69_v62  ;;  %v355_v30 = vld [vmem:[#allocation9 + $0x148] sm:$0xff]  ;;  %v322_v33 = vld [vmem:[#allocation9 + $0x40] sm:$0xff]  ;;  %v369_v36 = vld [vmem:[#allocation9 + $0x1b8] sm:$0xff] }
  0x49   :  { %183 = vmatpush1.msra.mxu0 %v66_v63  ;;  %260 = vmatpush1.msra.mxu1 %v68_v1  ;;  %v354_v34 = vld [vmem:[#allocation9 + $0x140] sm:$0xff]  ;;  %v321_v37 = vld [vmem:[#allocation9 + $0x38] sm:$0xff]  ;;  %v336_v39 = vld [vmem:[#allocation9 + $0xb0] sm:$0xff] }
  0x4a   :  { %217 = vmatmul.mubr.f32.vlgmr.msra.gmra.mxu0 %v64_v2  ;;  %294 = vmatmul.mubr.f32.vlgmr.msra.gmra.mxu1 %v64_v2  ;;  %v353_v38 = vld [vmem:[#allocation9 + $0x138] sm:$0xff]  ;;  %v368_v40 = vld [vmem:[#allocation9 + $0x1b0] sm:$0xff]  ;;  %v335_v43 = vld [vmem:[#allocation9 + $0xa8] sm:$0xff] }
  0x4b   :  { %222 = vmatprep.mubr.f32.mxu0 %v734_v0  ;;  %299 = vmatprep.mubr.f32.mxu1 %v734_v0  ;;  %v342_v0 = vld [vmem:[#allocation9 + $0xe0] sm:$0xff]  ;;  %v320_v41 = vld [vmem:[#allocation9 + $0x30] sm:$0xff]  ;;  %v367_v44 = vld [vmem:[#allocation9 + $0x1a8] sm:$0xff] }
  0x4c   :  { %556 = vmatprep.subr.mxu0 %v345_v3  ;;  %594 = vmatprep.subr.mxu1 %v377_v4  ;;  %v352_v42 = vld [vmem:[#allocation9 + $0x130] sm:$0xff]  ;;  %v319_v45 = vld [vmem:[#allocation9 + $0x28] sm:$0xff]  ;;  %v334_v47 = vld [vmem:[#allocation9 + $0xa0] sm:$0xff]  ;;  %v132_v4 = vlaneseq }
  0x4d   :  { %557 = vmatpush3.msra.mxu0 %v329_v5  ;;  %595 = vmatpush3.msra.mxu1 %v361_v6  ;;  %v351_v46 = vld [vmem:[#allocation9 + $0x128] sm:$0xff]  ;;  %v366_v48 = vld [vmem:[#allocation9 + $0x1a0] sm:$0xff]  ;;  %v333_v51 = vld [vmem:[#allocation9 + $0x98] sm:$0xff] }
  0x4e   :  { %223 = vmatmul.mubr.f32.gmra.mxu0 %v65_v7  ;;  %300 = vmatmul.mubr.f32.gmra.mxu1 %v65_v7  ;;  %v318_v49 = vld [vmem:[#allocation9 + $0x20] sm:$0xff]  ;;  %v365_v52 = vld [vmem:[#allocation9 + $0x198] sm:$0xff]  ;;  %v332_v55 = vld [vmem:[#allocation9 + $0x90] sm:$0xff]  ;;  %v133_v5 = vshrl.u32 %v132_v4, 7 }
  0x4f   :  { %558 = vmatprep.subr.mxu0 %v344_v8  ;;  %596 = vmatprep.subr.mxu1 %v376_v9  ;;  %v350_v50 = vld [vmem:[#allocation9 + $0x120] sm:$0xff]  ;;  %v317_v53 = vld [vmem:[#allocation9 + $0x18] sm:$0xff]  ;;  %v364_v56 = vld [vmem:[#allocation9 + $0x190] sm:$0xff] }
  0x50   :  { %559 = vmatpush3.msra.mxu0 %v328_v10  ;;  %597 = vmatpush3.msra.mxu1 %v360_v11  ;;  %v349_v54 = vld [vmem:[#allocation9 + $0x118] sm:$0xff]  ;;  %v316_v57 = vld [vmem:[#allocation9 + $0x10] sm:$0xff]  ;;  %v331_v59 = vld [vmem:[#allocation9 + $0x88] sm:$0xff]  ;;  %v142_v6 = vsub.s32 2, %v133_v5  ;;  %v134_v7 = vsub.s32 0, %v133_v5  ;;  %v138_v9 = vsub.s32 1, %v133_v5 }
  0x51   :  { %560 = vmatprep.subr.mxu0 %v343_v12  ;;  %598 = vmatprep.subr.mxu1 %v375_v13  ;;  %v348_v58 = vld [vmem:[#allocation9 + $0x110] sm:$0xff]  ;;  %v363_v60 = vld [vmem:[#allocation9 + $0x188] sm:$0xff]  ;;  %v330_v63 = vld [vmem:[#allocation9 + $0x80] sm:$0xff]  ;;  %v146_v10 = vsub.s32 3, %v133_v5 }
  0x52   :  { %561 = vmatpush3.msra.mxu0 %v327_v14  ;;  %599 = vmatpush3.msra.mxu1 %v359_v15  ;;  %v315_v61 = vld [vmem:[#allocation9 + $0x8] sm:$0xff]  ;;  %v362_v1 = vld [vmem:[#allocation9 + $0x180] sm:$0xff]  ;;  %v130_v8 = vld [vmem:[%s805_s3] sm:$0xf] }
  0x53   :  { %562 = vmatprep.subr.mxu0 %v342_v0  ;;  %600 = vmatprep.subr.mxu1 %v374_v16  ;;  %v347_v62 = vld [vmem:[#allocation9 + $0x108] sm:$0xff]  ;;  %v314_v2 = vld [vmem:[#allocation9] sm:$0xff]  ;;  %v143_v11 = vrot.slane %v130_v8, %v142_v6  ;;  %v135_v12 = vrot.slane %v130_v8, %v134_v7  ;;  %v139_v13 = vrot.slane %v130_v8, %v138_v9 }
  0x54   :  { %563 = vmatpush3.msra.mxu0 %v326_v17  ;;  %601 = vmatpush3.msra.mxu1 %v358_v18  ;;  %v346_v3 = vld [vmem:[#allocation9 + $0x100] sm:$0xff]  ;;  %v147_v14 = vrot.slane %v130_v8, %v146_v10 }
  0x55   :  { %564 = vmatprep.subr.mxu0 %v341_v19  ;;  %602 = vmatprep.subr.mxu1 %v373_v20 }
  0x56   :  { %565 = vmatpush3.msra.mxu0 %v325_v21  ;;  %603 = vmatpush3.msra.mxu1 %v357_v22 }
  0x57   :  { %566 = vmatprep.subr.mxu0 %v340_v23  ;;  %604 = vmatprep.subr.mxu1 %v372_v24 }
  0x58   :  { %567 = vmatpush3.msra.mxu0 %v324_v25  ;;  %605 = vmatpush3.msra.mxu1 %v356_v26 }
  0x59   :  { %568 = vmatprep.subr.mxu0 %v339_v27  ;;  %606 = vmatprep.subr.mxu1 %v371_v28 }
  0x5a   :  { %569 = vmatpush3.msra.mxu0 %v323_v29  ;;  %607 = vmatpush3.msra.mxu1 %v355_v30 }
  0x5b   :  { %570 = vmatprep.subr.mxu0 %v338_v31  ;;  %608 = vmatprep.subr.mxu1 %v370_v32 }
  0x5c   :  { %571 = vmatpush3.msra.mxu0 %v322_v33  ;;  %609 = vmatpush3.msra.mxu1 %v354_v34 }
  0x5d   :  { %572 = vmatprep.subr.mxu0 %v337_v35  ;;  %610 = vmatprep.subr.mxu1 %v369_v36 }
  0x5e   :  { %573 = vmatpush3.msra.mxu0 %v321_v37  ;;  %611 = vmatpush3.msra.mxu1 %v353_v38 }
  0x5f   :  { %574 = vmatprep.subr.mxu0 %v336_v39  ;;  %612 = vmatprep.subr.mxu1 %v368_v40  ;;  %v555_v40 = vld [vmem:[%s807_s5] ss:$0 sm:$0xff]  ;;  %s701_s5 = scalar_lea.vmem %s543_s16, 256 }
  0x60   :  { %575 = vmatpush3.msra.mxu0 %v320_v41  ;;  %613 = vmatpush3.msra.mxu1 %v352_v42  ;;  %p702_p1 = scmp.ne.s32.totalorder %s543_s16, %s701_s5  ;;  %p707_p3 = scmp.lt.s32.totalorder %s701_s5, %s701_s5 }
  0x61   :  { %576 = vmatprep.subr.mxu0 %v335_v43  ;;  %614 = vmatprep.subr.mxu1 %v367_v44 }
  0x62   :  { %577 = vmatpush3.msra.mxu0 %v319_v45  ;;  %615 = vmatpush3.msra.mxu1 %v351_v46  ;;  %p708_p4 = por %p707_p3, %p706_p2 }
  0x63   :  { %578 = vmatprep.subr.mxu0 %v334_v47  ;;  %616 = vmatprep.subr.mxu1 %v366_v48 }
  0x64   :  { %579 = vmatpush3.msra.mxu0 %v318_v49  ;;  %617 = vmatpush3.msra.mxu1 %v350_v50  ;;  %p709_p5 = pnand %p708_p4, %p702_p1 }
  0x65   :  { %580 = vmatprep.subr.mxu0 %v333_v51  ;;  %618 = vmatprep.subr.mxu1 %v365_v52 }
  0x66   :  { %581 = vmatpush3.msra.mxu0 %v317_v53  ;;  %619 = vmatpush3.msra.mxu1 %v349_v54 }
  0x67   :  { %582 = vmatprep.subr.mxu0 %v332_v55  ;;  %620 = vmatprep.subr.mxu1 %v364_v56 }
  0x68   :  { %583 = vmatpush3.msra.mxu0 %v316_v57  ;;  %621 = vmatpush3.msra.mxu1 %v348_v58 }
  0x69   :  { %584 = vmatprep.subr.mxu0 %v331_v59  ;;  %622 = vmatprep.subr.mxu1 %v363_v60 }
  0x6a   :  { %585 = vmatpush3.msra.mxu0 %v315_v61  ;;  %623 = vmatpush3.msra.mxu1 %v347_v62 }
  0x6b   :  { %586 = vmatprep.subr.mxu0 %v330_v63  ;;  %624 = vmatprep.subr.mxu1 %v362_v1 }
  0x6c   :  { %587 = vmatpush3.msra.mxu0 %v314_v2  ;;  %625 = vmatpush3.msra.mxu1 %v346_v3 }
 0x10a   :  { %v218_v15 = vpop.f32.mrf.mxu0  ;;  %v295_v0 = vpop.f32.mrf.mxu1 }
 0x10b   :  { %v296_v16 = vadd.f32 %v295_v0, %v143_v11  ;;  %v219_v17 = vadd.f32 %v218_v15, %v135_v12 }
 0x10c   :  { %v220_v18 = vpop.f32.mrf.mxu0  ;;  %v297_v19 = vpop.f32.mrf.mxu1 }
 0x10d   :  { %v221_v20 = vadd.f32 %v220_v18, %v139_v13  ;;  %v298_v21 = vadd.f32 %v297_v19, %v147_v14  ;;  %v308_v22 = vmax.f32 %v296_v16, 0.0  ;;  %v306_v28 = vmax.f32 %v219_v17, 0.0 }
 0x10e   :  { %v224_v23 = vpop.f32.mrf.mxu0  ;;  %v301_v24 = vpop.f32.mrf.mxu1 }
 0x10f   :  { %v307_v25 = vmax.f32 %v221_v20, 0.0  ;;  %v309_v26 = vmax.f32 %v298_v21, 0.0  ;;  %v302_v27 = vadd.f32 %v301_v24, %v143_v11  ;;  %v225_v29 = vadd.f32 %v224_v23, %v135_v12 }
 0x110   :  { %v226_v30 = vpop.f32.mrf.mxu0  ;;  %v303_v31 = vpop.f32.mrf.mxu1 }
 0x111   :  { %v227_v32 = vadd.f32 %v226_v30, %v139_v13  ;;  %v304_v33 = vadd.f32 %v303_v31, %v147_v14  ;;  %449 = vmatprep.mubr.f32.mxu0 %v307_v25  ;;  %524 = vmatprep.mubr.f32.mxu1 %v309_v26  ;;  %v312_v34 = vmax.f32 %v302_v27, 0.0  ;;  %v310_v37 = vmax.f32 %v225_v29, 0.0 }
 0x112   :  { %450 = vmatmul.mubr.f32.vlgmr.msra.gmra.mxu0 %v306_v28  ;;  %525 = vmatmul.mubr.f32.vlgmr.msra.gmra.mxu1 %v308_v22 }
 0x113   :  { %v311_v35 = vmax.f32 %v227_v32, 0.0  ;;  %v313_v36 = vmax.f32 %v304_v33, 0.0 }
 0x115   :  { %454 = vmatprep.mubr.f32.mxu0 %v311_v35  ;;  %529 = vmatprep.mubr.f32.mxu1 %v313_v36 }
 0x116   :  { %455 = vmatmul.mubr.f32.gmra.mxu0 %v310_v37  ;;  %530 = vmatmul.mubr.f32.gmra.mxu1 %v312_v34 }
 0x1d2   :  { %v588_v38 = vpop.f32.mrf.mxu0  ;;  %v626_v39 = vpop.f32.mrf.mxu1 }
 0x1d4   :  { %v589_v41 = vpop.f32.mrf.mxu0  ;;  %v627_v42 = vpop.f32.mrf.mxu1 }
 0x1d5   :  { %v590_v43 = vadd.f32 %v589_v41, %v588_v38  ;;  %v628_v47 = vadd.f32 %v627_v42, %v626_v39 }
 0x1d6   :  { %v591_v44 = vpop.f32.mrf.mxu0  ;;  %v629_v45 = vpop.f32.mrf.mxu1 }
 0x1d7   :  { %v452_v46 = vadd.f32 %v590_v43, %v555_v40 }
 0x1d8   :  { %v592_v48 = vpop.f32.mrf.mxu0  ;;  %v630_v49 = vpop.f32.mrf.mxu1 }
 0x1d9   :  { %v527_v50 = vadd.f32 %v628_v47, %v452_v46  ;;  %v593_v51 = vadd.f32 %v592_v48, %v591_v44  ;;  %v631_v53 = vadd.f32 %v630_v49, %v629_v45 }
 0x1db   :  { %535 = vst [vmem:[#allocation10] sm:$0xff] %v527_v50  ;;  %v457_v52 = vadd.f32 %v593_v51, %v555_v40 }
 0x1dd   :  { %v532_v54 = vadd.f32 %v631_v53, %v457_v52 }
 0x1df   :  { %536 = vst [vmem:[#allocation10 + $0x8] sm:$0xff] %v532_v54 }
 0x1e0   :  { %712 = shalt.err (!%p709_p5)
}
 0x1e1   :  { %548 = dma.vmem_to_hbm [thread:$0]  %s543_s16, 256, %s808_s6, [#allocation6], %s731_s30, %s731_s30, %s732_s7  }
 0x1e2   :  { %725 = dma.done.wait [#allocation6], 256  }
 0x1e3   :  { %726 = vsyncadd [#allocation6], 4294967040 }
 0x1e4   :  { %552 = vsyncpa [#allocation5], 1 }
 0x1e5   :  { %553 = vsyncpa [#allocation8], 1 }
 0x1e6   :  { %554 = vsyncpa [#allocation6], 1 }

</bundles_post_ra>
